<compile_context>
chip_gen: v5e
topology: v5e:2x2
jax: 0.10.0
libtpu: 0.0.40
codegen_flags: <defaults>
</compile_context>

<pallas_src>
import jax
import jax.numpy as jnp
from jax.experimental import pallas as pl
from jax.experimental.pallas import tpu as pltpu


def _round_up(x, m):
    return (x + m - 1) // m * m


def mlp_kernel(x_ref, w1_ref, b1_ref, w2_ref, b2_ref, o_ref):
    # First linear layer: h = x @ W1 (MXU, f32 accumulation).
    h = jnp.dot(x_ref[...], w1_ref[...], preferred_element_type=jnp.float32)
    # Bias add + ReLU epilogue in f32 on the VPU.
    h = jnp.maximum(h + b1_ref[...], 0.0)
    # Second linear layer: cast activation back to the matmul dtype, accumulate f32.
    y = jnp.dot(h.astype(w2_ref.dtype), w2_ref[...],
                preferred_element_type=jnp.float32)
    o_ref[...] = (y + b2_ref[...]).astype(o_ref.dtype)


def two_layer_nn(x, w1, b1, w2, b2, *, block_b=256, matmul_dtype=jnp.bfloat16):
    """Fused y = relu(x @ W1 + b1) @ W2 + b2.

    x: [B, D_in], w1: [D_in, H], b1: [H] or [1, H], w2: [H, D_out],
    b2: [D_out] or [1, D_out].  Returns f32 [B, D_out].
    """
    B, D_in = x.shape
    H = w1.shape[1]
    D_out = w2.shape[1]
    b1 = jnp.reshape(b1, (1, H))
    b2 = jnp.reshape(b2, (1, D_out))

    # Pad feature dims to the 128-lane width; pad batch to the batch tile.
    D_in_p = _round_up(D_in, 128)
    H_p = _round_up(H, 128)
    D_out_p = _round_up(D_out, 128)
    TB = min(block_b, _round_up(B, 8))   # batch tile (multiple of 8 sublanes)
    B_p = _round_up(B, TB)

    f32 = jnp.float32
    x_p = jnp.zeros((B_p, D_in_p), matmul_dtype).at[:B, :D_in].set(
        x.astype(matmul_dtype))
    w1_p = jnp.zeros((D_in_p, H_p), matmul_dtype).at[:D_in, :H].set(
        w1.astype(matmul_dtype))
    b1_p = jnp.zeros((1, H_p), f32).at[:, :H].set(b1.astype(f32))
    w2_p = jnp.zeros((H_p, D_out_p), matmul_dtype).at[:H, :D_out].set(
        w2.astype(matmul_dtype))
    b2_p = jnp.zeros((1, D_out_p), f32).at[:, :D_out].set(b2.astype(f32))

    grid = (pl.cdiv(B_p, TB),)

    # Derive an explicit VMEM budget (keeps the config valid on v7x's 64 MiB).
    itemsize = jnp.dtype(matmul_dtype).itemsize
    resident = (D_in_p * H_p + H_p * D_out_p) * itemsize + (H_p + D_out_p) * 4
    per_step_io = TB * (D_in_p * itemsize + D_out_p * 4)       # x tile + out tile
    working = TB * (H_p + D_out_p) * 4                          # f32 h / y temps
    vmem_bytes = 2 * resident + 2 * 2 * per_step_io + 2 * working  # 2x headroom
    vmem_bytes = int(min(max(vmem_bytes, 16 * 1024 * 1024), 64 * 1024 * 1024))

    # TODO(synk): for production-size H (e.g. 16K) add a trailing reduction grid
    # axis over H with an f32 VMEM accumulator instead of materializing [TB, H].

    out = pl.pallas_call(
        mlp_kernel,
        out_shape=jax.ShapeDtypeStruct((B_p, D_out_p), jnp.float32),
        grid=grid,
        in_specs=[
            pl.BlockSpec((TB, D_in_p), lambda i: (i, 0)),      # batch-tiled input
            pl.BlockSpec((D_in_p, H_p), lambda i: (0, 0)),     # resident W1
            pl.BlockSpec((1, H_p), lambda i: (0, 0)),          # resident b1
            pl.BlockSpec((H_p, D_out_p), lambda i: (0, 0)),    # resident W2
            pl.BlockSpec((1, D_out_p), lambda i: (0, 0)),      # resident b2
        ],
        out_specs=pl.BlockSpec((TB, D_out_p), lambda i: (i, 0)),
        compiler_params=pltpu.CompilerParams(
            dimension_semantics=("parallel",),
            vmem_limit_bytes=vmem_bytes,
        ),
    )(x_p, w1_p, b1_p, w2_p, b2_p)

    return out[:B, :D_out]


if __name__ == "__main__":
    # Small shapes consistent with the module's forward: flattened image features,
    # hidden H, output D_out.  B large enough to exercise the batch grid (2 tiles).
    B, D_in, H, D_out = 512, 64, 32, 16

    key = jax.random.PRNGKey(0)
    kx, kw1, kb1, kw2, kb2 = jax.random.split(key, 5)

    # Input normalized by its std, mimicking `images = images / images.std()`.
    x = jax.random.normal(kx, (B, D_in), dtype=jnp.float32)
    x = x / jnp.std(x)

    # Deterministic parameter init mimicking torch.nn.Linear (uniform +/- 1/sqrt(fan_in)).
    bound1 = 1.0 / (D_in ** 0.5)
    w1 = jax.random.uniform(kw1, (D_in, H), jnp.float32, -bound1, bound1)
    b1 = jax.random.uniform(kb1, (1, H), jnp.float32, -bound1, bound1)
    bound2 = 1.0 / (H ** 0.5)
    w2 = jax.random.uniform(kw2, (H, D_out), jnp.float32, -bound2, bound2)
    b2 = jax.random.uniform(kb2, (1, D_out), jnp.float32, -bound2, bound2)

    y = two_layer_nn(x, w1, b1, w2, b2)
    y = jax.block_until_ready(y)
    assert y.shape == (B, D_out)

    # Reference 1: same bf16-rounded inputs, f32 accumulation (tight check).
    def rt(a):  # round-trip through bf16, like the kernel's matmul inputs
        return a.astype(jnp.bfloat16).astype(jnp.float32)
    h_ref = jnp.maximum(rt(x) @ rt(w1) + b1, 0.0)
    y_ref_bf16 = rt(h_ref) @ rt(w2) + b2
    assert jnp.allclose(y, y_ref_bf16, atol=1e-3, rtol=1e-3)

    # Reference 2: pure f32 math (semantics of the PyTorch module, loose tolerance
    # for the bf16 matmul inputs).
    y_ref_f32 = jnp.maximum(x @ w1 + b1, 0.0) @ w2 + b2
    assert jnp.allclose(y, y_ref_f32, atol=2e-2, rtol=2e-2)

    print("KERNEL_OK")
</pallas_src>

<mosaic_0001>
module attributes {stable_mosaic.version = 11 : i64} {
  func.func @mlp_kernel(%arg0: i32, %arg1: memref<256x128xbf16, #tpu.memory_space<vmem>>, %arg2: memref<128x128xbf16, #tpu.memory_space<vmem>>, %arg3: memref<1x128xf32, #tpu.memory_space<vmem>>, %arg4: memref<128x128xbf16, #tpu.memory_space<vmem>>, %arg5: memref<1x128xf32, #tpu.memory_space<vmem>>, %arg6: memref<256x128xf32, #tpu.memory_space<vmem>>) attributes {dimension_semantics = [#tpu.dimension_semantics<parallel>], iteration_bounds = array<i64: 2>, scalar_prefetch = 0 : i64, scratch_operands = 0 : i64, tpu.core_type = #tpu.core_type<tc>, window_params = [{transform_indices = @transform_0, window_bounds = array<i64: 256, 128>}, {pipeline_mode = #tpu.pipeline_mode<synchronous>, transform_indices = @transform_1, window_bounds = array<i64: 128, 128>}, {pipeline_mode = #tpu.pipeline_mode<synchronous>, transform_indices = @transform_2, window_bounds = array<i64: 1, 128>}, {pipeline_mode = #tpu.pipeline_mode<synchronous>, transform_indices = @transform_3, window_bounds = array<i64: 128, 128>}, {pipeline_mode = #tpu.pipeline_mode<synchronous>, transform_indices = @transform_4, window_bounds = array<i64: 1, 128>}, {transform_indices = @transform_5, window_bounds = array<i64: 256, 128>}]} {
    %c0 = arith.constant 0 : index
    %c0_0 = arith.constant 0 : index
    %0 = vector.load %arg1[%c0, %c0_0] : memref<256x128xbf16, #tpu.memory_space<vmem>>, vector<256x128xbf16>
    %c0_1 = arith.constant 0 : index
    %c0_2 = arith.constant 0 : index
    %1 = vector.load %arg2[%c0_1, %c0_2] : memref<128x128xbf16, #tpu.memory_space<vmem>>, vector<128x128xbf16>
    %cst = arith.constant dense<0.000000e+00> : vector<256x128xf32>
    %2 = tpu.matmul %0, %1, %cst {dimension_numbers = #tpu.dot_dimension_numbers<[1], [0], [0], [1], [0, 0, 1, 1], [], []>} : vector<256x128xbf16>, vector<128x128xbf16>, vector<256x128xf32> -> vector<256x128xf32>
    %c0_3 = arith.constant 0 : index
    %c0_4 = arith.constant 0 : index
    %3 = vector.load %arg3[%c0_3, %c0_4] : memref<1x128xf32, #tpu.memory_space<vmem>>, vector<1x128xf32>
    %4 = vector.broadcast %3 : vector<1x128xf32> to vector<256x128xf32>
    %5 = arith.addf %2, %4 : vector<256x128xf32>
    %cst_5 = arith.constant 0.000000e+00 : f32
    %6 = vector.broadcast %cst_5 : f32 to vector<256x128xf32>
    %7 = arith.maximumf %5, %6 : vector<256x128xf32>
    %8 = arith.truncf %7 : vector<256x128xf32> to vector<256x128xbf16>
    %c0_6 = arith.constant 0 : index
    %c0_7 = arith.constant 0 : index
    %9 = vector.load %arg4[%c0_6, %c0_7] : memref<128x128xbf16, #tpu.memory_space<vmem>>, vector<128x128xbf16>
    %cst_8 = arith.constant dense<0.000000e+00> : vector<256x128xf32>
    %10 = tpu.matmul %8, %9, %cst_8 {dimension_numbers = #tpu.dot_dimension_numbers<[1], [0], [0], [1], [0, 0, 1, 1], [], []>} : vector<256x128xbf16>, vector<128x128xbf16>, vector<256x128xf32> -> vector<256x128xf32>
    %c0_9 = arith.constant 0 : index
    %c0_10 = arith.constant 0 : index
    %11 = vector.load %arg5[%c0_9, %c0_10] : memref<1x128xf32, #tpu.memory_space<vmem>>, vector<1x128xf32>
    %12 = vector.broadcast %11 : vector<1x128xf32> to vector<256x128xf32>
    %13 = arith.addf %10, %12 : vector<256x128xf32>
    %c0_11 = arith.constant 0 : index
    %c0_12 = arith.constant 0 : index
    %14 = vector.load %arg6[%c0_11, %c0_12] : memref<256x128xf32, #tpu.memory_space<vmem>>, vector<256x128xf32>
    tpu.vector_store %arg6[%c0_11, %c0_12], %13 {strides = array<i32>} : memref<256x128xf32, #tpu.memory_space<vmem>>, vector<256x128xf32>,
    return
  }
  func.func @transform_0(%arg0: i32) -> (i32, i32) {
    %c0_i32 = arith.constant 0 : i32
    %c0_i32_0 = arith.constant 0 : i32
    return %arg0, %c0_i32 : i32, i32
  }
  func.func @transform_1(%arg0: i32) -> (i32, i32) {
    %c0_i32 = arith.constant 0 : i32
    %c0_i32_0 = arith.constant 0 : i32
    %c0_i32_1 = arith.constant 0 : i32
    return %c0_i32, %c0_i32_0 : i32, i32
  }
  func.func @transform_2(%arg0: i32) -> (i32, i32) {
    %c0_i32 = arith.constant 0 : i32
    %c0_i32_0 = arith.constant 0 : i32
    %c0_i32_1 = arith.constant 0 : i32
    return %c0_i32, %c0_i32_0 : i32, i32
  }
  func.func @transform_3(%arg0: i32) -> (i32, i32) {
    %c0_i32 = arith.constant 0 : i32
    %c0_i32_0 = arith.constant 0 : i32
    %c0_i32_1 = arith.constant 0 : i32
    return %c0_i32, %c0_i32_0 : i32, i32
  }
  func.func @transform_4(%arg0: i32) -> (i32, i32) {
    %c0_i32 = arith.constant 0 : i32
    %c0_i32_0 = arith.constant 0 : i32
    %c0_i32_1 = arith.constant 0 : i32
    return %c0_i32, %c0_i32_0 : i32, i32
  }
  func.func @transform_5(%arg0: i32) -> (i32, i32) {
    %c0_i32 = arith.constant 0 : i32
    %c0_i32_0 = arith.constant 0 : i32
    return %arg0, %c0_i32 : i32, i32
  }
}

</mosaic_0001>

<bundles_post_ra>
// kernel: tpu_custom_call.1
= control target key start
LH: loop header
LB: loop body
LE: loop exit
PB: predicated region body
PF: predicated region fallthrough
CT: control target
= control target key end

     0   :  { %10 = vsyncpa [#allocation3], 0  ;;  %s1655_s0 = inlined_call_operand.hbm [shape: bf16[512,128], index: 0, kind: input, shape index: {}]   ;;  %s1656_s1 = inlined_call_operand.hbm [shape: bf16[128,128], index: 1, kind: input, shape index: {}]   ;;  %s1657_s2 = inlined_call_operand.vmem [shape: f32[1,128], index: 2, kind: input, shape index: {}]   ;;  %s1658_s3 = inlined_call_operand.hbm [shape: bf16[128,128], index: 3, kind: input, shape index: {}]   ;;  %s1659_s4 = inlined_call_operand.vmem [shape: f32[1,128], index: 4, kind: input, shape index: {}]   ;;  %s1660_s5 = inlined_call_operand.hbm [shape: f32[512,128], index: 5, kind: output, shape index: {}]  }
   0x1   :  { %12 = vsyncpa [#allocation3 + $0x1], 0 }
   0x2   :  { %13 = vsyncpa [#allocation6], 0 }
   0x3   :  { %14 = vsyncpa [#allocation4], 0 }
   0x4   :  { %16 = vsyncpa [#allocation4 + $0x1], 0  ;;  %s1377_s18 = smov 0   ;;  %s1379_s19 = smov 0  }
   0x5   :  { %s1381_s20 = smov 0   ;;  %s1383_s21 = smov 0  }
   0x6 LB: > { %s1398_s22 = sadd.s32 4294967295, %s1339_s21   ;;  %s910_s23 = sadd.s32 4294967294, %s1339_s21   ;;  %s1339_s21 = sphi %s1383_s21, %s1672_s21   ;;  %s1335_s20 = sphi %s1381_s20, %s1671_s20   ;;  %s1331_s19 = sphi %s1379_s19, %s1670_s19   ;;  %s1327_s18 = sphi %s1377_s18, %s1669_s18  }
   0x7   : > { %p42_p0 = scmp.ne.s32.totalorder %s1331_s19, %s1327_s18  ;;  %p43_p1 = scmp.eq.s32.totalorder %s1398_s22, 0 }
   0x8   : > { %p150_p2 = scmp.eq.s32.totalorder %s1398_s22, 1  ;;  %p156_p3 = scmp.eq.s32.totalorder %s910_s23, 1 }
   0x9   : > { %p1407_p4 = por %p43_p1, %p42_p0  ;;  %p911_p5 = scmp.ge.s32.totalorder %s1339_s21, 1 }
   0xa   : > { %p1412_p6 = por %p156_p3, %p42_p0  ;;  %p163_p7 = scmp.lt.s32.totalorder %s1339_s21, 3 }
   0xb   : > { %s174_s28 = sshll.u32 %s1656_s1, 4  ;;  %s1341_s30 = smov [#allocation5]   ;;  %s175_s28 = int_to_ptr.hbm [resolvable:$true] %s174_s28 }
   0xc   : > { %p1420_p8 = pnand %p911_p5, %p163_p7  ;;  %s176_s6 = sshll.u32 %s1341_s30, 4  ;;  %s177_s6 = int_to_ptr.vmem [resolvable:$true] %s176_s6 }
   0xd   : > { %s191_s9 = sshll.u32 %s1658_s3, 4  ;;  %s1661_s10 = smov 64   ;;  %s192_s9 = int_to_ptr.hbm [resolvable:$true] %s191_s9 }
   0xe   : > { %p1118_p9 = pneg %p1420_p8  ;;  %s1343_s11 = smov 4  }
   0xf   : > { %s1344_s12 = smov [#allocation7]   ;;  %s1439_s14 = sadd.s32 1, %s1339_s21  }
  0x10   : > { %p1119_p10 = pnand %p1118_p9, %p43_p1  ;;  %s193_s13 = sshll.u32 %s1344_s12, 4  ;;  %s194_s13 = int_to_ptr.vmem [resolvable:$true] %s193_s13 }
  0x11   : > { %s29_s15 = sadd.s32 1, %s1335_s20  ;;  %s26_s16 = ssub.s32 %s1339_s21, %s1439_s14 }
  0x12   : > { %1121 = dma.hbm_to_vmem [thread:$0]  (!%p1119_p10), %s175_s28, 1024, %s177_s6, [#allocation6], %s1661_s10, %s1661_s10, %s1343_s11  }
  0x13   : > { %1124 = dma.hbm_to_vmem [thread:$0]  (!%p1119_p10), %s192_s9, 1024, %s194_s13, [#allocation6], %s1661_s10, %s1661_s10, %s1343_s11  }
  0x14   : > { %p36_p12 = scmp.ne.s32.totalorder %s1335_s20, %s1331_s19  ;;  %p27_p13 = scmp.eq.s32.totalorder %s26_s16, 0 }
  0x15   : > { %p37_p0 = scmp.eq.s32.totalorder %s1339_s21, 0  ;;  %p1135_p5 = scmp.lt.s32.totalorder %s1339_s21, 2 }
  0x16   : > { %p1449_p3 = por %p150_p2, %p36_p12  ;;  %s210_s26 = sand.u32 1, %s1335_s20  }
  0x17   : > { %s1455_s23 = scalar_select %p27_p13, %s1335_s20, %s29_s15  }
  0x18   : > { %p38_p7 = por %p37_p0, %p36_p12  ;;  %s915_s27 = sshll.u32 %s210_s26, 7 }
  0x19   : > { %s1056_s28 = sshll.u32 %s1339_s21, 7  ;;  %s214_s8 = scalar_lea.vmem [#allocation2], %s915_s27 }
  0x1a   : > { %s219_s7 = scalar_lea.hbm %s1655_s0, %s1056_s28  ;;  %s222_s9 = sshll.u32 %s214_s8, 4  ;;  %s223_s9 = int_to_ptr.vmem [resolvable:$true] %s222_s9 }
  0x1b   : > { %s220_s12 = sshll.u32 %s219_s7, 4  ;;  %p1462_p2 = pnand %p1135_p5, %p38_p7  ;;  %s221_s12 = int_to_ptr.hbm [resolvable:$true] %s220_s12 }
  0x1c   : > { %s211_s15 = scalar_lea.sflag [#allocation3], %s210_s26  ;;  %s1239_s16 = sshra.s32 %s221_s12, 4  ;;  %s1240_s16 = int_to_ptr.hbm [resolvable:$true] %s1239_s16 }
  0x1d   : > { %s1241_s10 = scalar_lea.hbm %s1240_s16, 128  ;;  %p1243_p10 = pneg %p1462_p2 }
  0x1e   : > { %p1242_p9 = scmp.ne.s32.totalorder %s1240_s16, %s1241_s10  ;;  %s1246_s30 = scalar_lea.hbm %s1655_s0, 256 }
  0x1f   : > { %p1247_p0 = scmp.lt.s32.totalorder %s1240_s16, %s1655_s0  ;;  %p1248_p5 = scmp.lt.s32.totalorder %s1246_s30, %s1241_s10 }
  0x20   : > { %p1244_p12 = pnand %p1243_p10, %p1242_p9 }
  0x21   : > { %p1249_p7 = por %p1248_p5, %p1247_p0 }
  0x22   : > { %p1245_p13 = pneg %p1244_p12 }
  0x24   : > { %p1250_p11 = pnand %p1249_p7, %p1245_p13 }
  0x26   : > { %1253 = shalt.err (!%p1250_p11)
}
  0x27   : > { %s1667_s26 = smov 64   ;;  %234 = sbr.rel (%p1420_p8) target bundleno = 483 (0x1e3), region = 40 }
  0x28   : > { %1128 = dma.hbm_to_vmem [thread:$0]  (!%p1462_p2), %s221_s12, 2048, %s223_s9, %s211_s15, %s1667_s26, %s1667_s26, %s1343_s11  }
  0x29   : > { %s1482_s8 = sand.u32 (!%p1420_p8), 1, %s1331_s19  }
  0x2a   : > { %s919_s16 = sshll.u32 (!%p1420_p8), %s1482_s8, 7  ;;  %s237_s10 = scalar_lea.sflag (!%p1420_p8), [#allocation3], %s1482_s8 }
  0x2b   : > { %s1486_s28 = scalar_lea.vmem (!%p1420_p8), [#allocation2], %s919_s16 }
  0x2c   : > { %1314 = dma.done.wait (%p1407_p4), %s237_s10, 2048  }
  0x2d   : > { %1316 = vsyncadd (%p1407_p4), %s237_s10, 4294965248 }
  0x2e   : > { %1318 = dma.done.wait (%p43_p1), [#allocation6], 2048  }
  0x2f   : > { %1320 = vsyncadd (%p43_p1), [#allocation6], 4294965248  ;;  %v1080_v0 = vld [vmem:[#allocation5 + $0x38] sm:$0xff]  ;;  %v1079_v1 = vld [vmem:[#allocation5 + $0x30] sm:$0xff]  ;;  %s922_s11 = sshll.u32 %s1482_s8, 8  ;;  %s1089_s15 = sshll.u32 %s1398_s22, 8 }
  0x30   : > { %476 = vmatpush.bf16.msra.mxu0 %v1080_v0  ;;  %1090 = vmatpush.bf16.msra.mxu2 %v1080_v0  ;;  %v1078_v2 = vld [vmem:[#allocation5 + $0x28] sm:$0xff]  ;;  %v1077_v3 = vld [vmem:[#allocation5 + $0x20] sm:$0xff]  ;;  %v1076_v4 = vld [vmem:[#allocation5 + $0x18] sm:$0xff]  ;;  %s1556_s13 = scalar_lea.vmem [#allocation8], %s922_s11  ;;  %s814_s6 = scalar_lea.hbm %s1660_s5, %s1089_s15 }
  0x31   : > { %v1075_v5 = vld [vmem:[#allocation5 + $0x10] sm:$0xff]  ;;  %v1074_v6 = vld [vmem:[#allocation5 + $0x8] sm:$0xff]  ;;  %v1073_v7 = vld [vmem:[#allocation5] sm:$0xff]  ;;  %s815_s7 = sshll.u32 %s1556_s13, 4  ;;  %s817_s26 = sshll.u32 %s814_s6, 4  ;;  %s816_s7 = int_to_ptr.vmem [resolvable:$true] %s815_s7  ;;  %s818_s26 = int_to_ptr.hbm [resolvable:$true] %s817_s26 }
  0x32   : > { %v1057_v8 = vld [vmem:[%s1486_s28] sm:$0xff]  ;;  %v1058_v10 = vld [vmem:[%s1486_s28 + $0x8] sm:$0xff]  ;;  %v1059_v12 = vld [vmem:[%s1486_s28 + $0x10] sm:$0xff]  ;;  %s803_s16 = scalar_lea.sflag [#allocation4], %s1482_s8  ;;  %s1283_s10 = sshra.s32 %s818_s26, 4  ;;  %s1284_s10 = int_to_ptr.hbm [resolvable:$true] %s1283_s10 }
  0x33   : > { %v1065_v9 = vld [vmem:[%s1486_s28 + $0x40] sm:$0xff]  ;;  %v1066_v11 = vld [vmem:[%s1486_s28 + $0x48] sm:$0xff]  ;;  %v1067_v13 = vld [vmem:[%s1486_s28 + $0x50] sm:$0xff]  ;;  %s1285_s22 = scalar_lea.hbm %s1284_s10, 256  ;;  %s1289_s29 = scalar_lea.hbm %s1660_s5, 512 }
  0x34   : > { %477 = vmatpush.bf16.msra.mxu0 %v1079_v1  ;;  %1091 = vmatpush.bf16.msra.mxu2 %v1079_v1  ;;  %v1060_v14 = vld [vmem:[%s1486_s28 + $0x18] sm:$0xff]  ;;  %v1061_v16 = vld [vmem:[%s1486_s28 + $0x20] sm:$0xff]  ;;  %v1062_v19 = vld [vmem:[%s1486_s28 + $0x28] sm:$0xff]  ;;  %p1286_p1 = scmp.ne.s32.totalorder %s1284_s10, %s1285_s22  ;;  %p1290_p11 = scmp.lt.s32.totalorder %s1284_s10, %s1660_s5 }
  0x35   : > { %v1068_v15 = vld [vmem:[%s1486_s28 + $0x58] sm:$0xff]  ;;  %v1069_v17 = vld [vmem:[%s1486_s28 + $0x60] sm:$0xff]  ;;  %v1070_v20 = vld [vmem:[%s1486_s28 + $0x68] sm:$0xff]  ;;  %p1291_p2 = scmp.lt.s32.totalorder %s1289_s29, %s1285_s22 }
  0x36   : > { %v1088_v18 = vld [vmem:[#allocation7 + $0x38] sm:$0xff]  ;;  %v1087_v21 = vld [vmem:[#allocation7 + $0x30] sm:$0xff]  ;;  %v1086_v22 = vld [vmem:[#allocation7 + $0x28] sm:$0xff]  ;;  %p1287_p4 = pnand %p1286_p1, %p1449_p3 }
  0x37   : > { %681 = vmatpush.bf16.msra.mxu1 %v1088_v18  ;;  %1098 = vmatpush.bf16.msra.mxu3 %v1088_v18  ;;  %v1085_v23 = vld [vmem:[#allocation7 + $0x20] sm:$0xff]  ;;  %v1084_v24 = vld [vmem:[#allocation7 + $0x18] sm:$0xff]  ;;  %v1063_v25 = vld [vmem:[%s1486_s28 + $0x30] sm:$0xff]  ;;  %p1292_p9 = por %p1291_p2, %p1290_p11 }
  0x38   : > { %478 = vmatpush.bf16.msra.mxu0 %v1078_v2  ;;  %1092 = vmatpush.bf16.msra.mxu2 %v1078_v2  ;;  %v1071_v26 = vld [vmem:[%s1486_s28 + $0x70] sm:$0xff]  ;;  %v1082_v28 = vld [vmem:[#allocation7 + $0x8] sm:$0xff]  ;;  %v1081_v29 = vld [vmem:[#allocation7] sm:$0xff]  ;;  %p1288_p8 = pneg %p1287_p4 }
  0x39   : > { %v1083_v27 = vld [vmem:[#allocation7 + $0x10] sm:$0xff]  ;;  %v1064_v30 = vld [vmem:[%s1486_s28 + $0x38] sm:$0xff]  ;;  %v1515_v33 = vld [vmem:[%s1657_s2] ss:$0 sm:$0xff] }
  0x3a   : > { %v1072_v31 = vld [vmem:[%s1486_s28 + $0x78] sm:$0xff]  ;;  %p1293_p10 = pnand %p1292_p9, %p1288_p8 }
  0x3b   : > { %682 = vmatpush.bf16.msra.mxu1 %v1087_v21  ;;  %1099 = vmatpush.bf16.msra.mxu3 %v1087_v21 }
  0x3c   : > { %479 = vmatpush.bf16.msra.mxu0 %v1077_v3  ;;  %1093 = vmatpush.bf16.msra.mxu2 %v1077_v3 }
  0x3f   : > { %683 = vmatpush.bf16.msra.mxu1 %v1086_v22  ;;  %1100 = vmatpush.bf16.msra.mxu3 %v1086_v22 }
  0x40   : > { %480 = vmatpush.bf16.msra.mxu0 %v1076_v4  ;;  %1094 = vmatpush.bf16.msra.mxu2 %v1076_v4 }
  0x43   : > { %684 = vmatpush.bf16.msra.mxu1 %v1085_v23  ;;  %1101 = vmatpush.bf16.msra.mxu3 %v1085_v23 }
  0x44   : > { %481 = vmatpush.bf16.msra.mxu0 %v1075_v5  ;;  %1095 = vmatpush.bf16.msra.mxu2 %v1075_v5 }
  0x47   : > { %685 = vmatpush.bf16.msra.mxu1 %v1084_v24  ;;  %1102 = vmatpush.bf16.msra.mxu3 %v1084_v24 }
  0x48   : > { %482 = vmatpush.bf16.msra.mxu0 %v1074_v6  ;;  %1096 = vmatpush.bf16.msra.mxu2 %v1074_v6 }
  0x4b   : > { %686 = vmatpush.bf16.msra.mxu1 %v1083_v27  ;;  %1103 = vmatpush.bf16.msra.mxu3 %v1083_v27 }
  0x4c   : > { %483 = vmatpush.bf16.msra.mxu0 %v1073_v7  ;;  %1097 = vmatpush.bf16.msra.mxu2 %v1073_v7 }
  0x4f   : > { %484 = vmatmul.bf16.vlgmr.msra.gmra.mxu0 %v1057_v8  ;;  %524 = vmatmul.bf16.vlgmr.msra.gmra.mxu2 %v1065_v9 }
  0x50   : > { %687 = vmatpush.bf16.msra.mxu1 %v1082_v28  ;;  %1104 = vmatpush.bf16.msra.mxu3 %v1082_v28 }
  0x54   : > { %688 = vmatpush.bf16.msra.mxu1 %v1081_v29  ;;  %1105 = vmatpush.bf16.msra.mxu3 %v1081_v29 }
  0x5f   : > { %489 = vmatmul.bf16.gmra.mxu0 %v1058_v10  ;;  %529 = vmatmul.bf16.gmra.mxu2 %v1066_v11 }
  0x6f   : > { %494 = vmatmul.bf16.gmra.mxu0 %v1059_v12  ;;  %534 = vmatmul.bf16.gmra.mxu2 %v1067_v13 }
  0x7f   : > { %499 = vmatmul.bf16.gmra.mxu0 %v1060_v14  ;;  %539 = vmatmul.bf16.gmra.mxu2 %v1068_v15 }
  0x8f   : > { %504 = vmatmul.bf16.gmra.mxu0 %v1061_v16  ;;  %544 = vmatmul.bf16.gmra.mxu2 %v1069_v17 }
  0x9f   : > { %509 = vmatmul.bf16.gmra.mxu0 %v1062_v19  ;;  %549 = vmatmul.bf16.gmra.mxu2 %v1070_v20 }
  0xaf   : > { %514 = vmatmul.bf16.gmra.mxu0 %v1063_v25  ;;  %554 = vmatmul.bf16.gmra.mxu2 %v1071_v26 }
  0xbf   : > { %519 = vmatmul.bf16.gmra.mxu0 %v1064_v30  ;;  %559 = vmatmul.bf16.gmra.mxu2 %v1072_v31 }
  0xcc   : > { %v485_v32 = vpop.f32.mrf.mxu0 }
  0xcd   : > { %v486_v34 = vadd.f32 %v1515_v33, %v485_v32 }
  0xcf   : > { %v565_v37 = vmax.f32 %v486_v34, 0.0 }
  0xd2   : > { %v525_v35 = vpop.f32.mrf.mxu2 }
  0xd3   : > { %v526_v40 = vadd.f32 %v1515_v33, %v525_v35 }
  0xd4   : > { %v487_v36 = vpop.f32.mrf.mxu0 }
  0xd5   : > { %v488_v38 = vadd.f32 %v1515_v33, %v487_v36  ;;  %v581_v45 = vmax.f32 %v526_v40, 0.0 }
  0xd7   : > { %v566_v39 = vmax.f32 %v488_v38, 0.0 }
  0xd9   : > { %v597_v41 = vpack.c.bf16 %v566_v39, %v565_v37 }
  0xda   : > { %v527_v42 = vpop.f32.mrf.mxu2 }
  0xdb   : > { %v528_v43 = vadd.f32 %v1515_v33, %v527_v42  ;;  %689 = vmatmul.bf16.vlgmr.msra.gmra.mxu1 %v597_v41 }
  0xdc   : > { %v490_v44 = vpop.f32.mrf.mxu0 }
  0xdd   : > { %v582_v46 = vmax.f32 %v528_v43, 0.0  ;;  %v491_v48 = vadd.f32 %v1515_v33, %v490_v44 }
  0xdf   : > { %v605_v47 = vpack.c.bf16 %v582_v46, %v581_v45  ;;  %v567_v51 = vmax.f32 %v491_v48, 0.0 }
  0xe1   : > { %729 = vmatmul.bf16.vlgmr.msra.gmra.mxu3 %v605_v47 }
  0xe2   : > { %v530_v49 = vpop.f32.mrf.mxu2 }
  0xe3   : > { %v531_v54 = vadd.f32 %v1515_v33, %v530_v49 }
  0xe4   : > { %v492_v50 = vpop.f32.mrf.mxu0 }
  0xe5   : > { %v493_v52 = vadd.f32 %v1515_v33, %v492_v50  ;;  %v583_v59 = vmax.f32 %v531_v54, 0.0 }
  0xe7   : > { %v568_v53 = vmax.f32 %v493_v52, 0.0 }
  0xe9   : > { %v598_v55 = vpack.c.bf16 %v568_v53, %v567_v51 }
  0xea   : > { %v532_v56 = vpop.f32.mrf.mxu2 }
  0xeb   : > { %v533_v57 = vadd.f32 %v1515_v33, %v532_v56  ;;  %694 = vmatmul.bf16.gmra.mxu1 %v598_v55 }
  0xec   : > { %v495_v58 = vpop.f32.mrf.mxu0 }
  0xed   : > { %v584_v60 = vmax.f32 %v533_v57, 0.0  ;;  %v496_v62 = vadd.f32 %v1515_v33, %v495_v58 }
  0xef   : > { %v606_v61 = vpack.c.bf16 %v584_v60, %v583_v59  ;;  %v569_v1 = vmax.f32 %v496_v62, 0.0 }
  0xf1   : > { %734 = vmatmul.bf16.gmra.mxu3 %v606_v61 }
  0xf2   : > { %v535_v63 = vpop.f32.mrf.mxu2 }
  0xf3   : > { %v536_v4 = vadd.f32 %v1515_v33, %v535_v63 }
  0xf4   : > { %v497_v0 = vpop.f32.mrf.mxu0 }
  0xf5   : > { %v498_v2 = vadd.f32 %v1515_v33, %v497_v0  ;;  %v585_v9 = vmax.f32 %v536_v4, 0.0 }
  0xf7   : > { %v570_v3 = vmax.f32 %v498_v2, 0.0 }
  0xf9   : > { %v599_v5 = vpack.c.bf16 %v570_v3, %v569_v1 }
  0xfa   : > { %v537_v6 = vpop.f32.mrf.mxu2 }
  0xfb   : > { %v538_v7 = vadd.f32 %v1515_v33, %v537_v6  ;;  %699 = vmatmul.bf16.gmra.mxu1 %v599_v5 }
  0xfc   : > { %v500_v8 = vpop.f32.mrf.mxu0 }
  0xfd   : > { %v586_v10 = vmax.f32 %v538_v7, 0.0  ;;  %v501_v12 = vadd.f32 %v1515_v33, %v500_v8 }
  0xff   : > { %v607_v11 = vpack.c.bf16 %v586_v10, %v585_v9  ;;  %v571_v15 = vmax.f32 %v501_v12, 0.0 }
 0x101   : > { %739 = vmatmul.bf16.gmra.mxu3 %v607_v11 }
 0x102   : > { %v540_v13 = vpop.f32.mrf.mxu2 }
 0x103   : > { %v541_v18 = vadd.f32 %v1515_v33, %v540_v13 }
 0x104   : > { %v502_v14 = vpop.f32.mrf.mxu0 }
 0x105   : > { %v503_v16 = vadd.f32 %v1515_v33, %v502_v14  ;;  %v587_v23 = vmax.f32 %v541_v18, 0.0  ;;  %v1553_v18 = vld [vmem:[%s1659_s4] ss:$0 sm:$0xff] }
 0x107   : > { %v572_v17 = vmax.f32 %v503_v16, 0.0 }
 0x109   : > { %v600_v19 = vpack.c.bf16 %v572_v17, %v571_v15 }
 0x10a   : > { %v542_v20 = vpop.f32.mrf.mxu2 }
 0x10b   : > { %v543_v21 = vadd.f32 %v1515_v33, %v542_v20  ;;  %704 = vmatmul.bf16.gmra.mxu1 %v600_v19 }
 0x10c   : > { %v505_v22 = vpop.f32.mrf.mxu0 }
 0x10d   : > { %v588_v24 = vmax.f32 %v543_v21, 0.0  ;;  %v506_v26 = vadd.f32 %v1515_v33, %v505_v22 }
 0x10f   : > { %v608_v25 = vpack.c.bf16 %v588_v24, %v587_v23  ;;  %v573_v29 = vmax.f32 %v506_v26, 0.0 }
 0x111   : > { %744 = vmatmul.bf16.gmra.mxu3 %v608_v25 }
 0x112   : > { %v545_v27 = vpop.f32.mrf.mxu2 }
 0x113   : > { %v546_v32 = vadd.f32 %v1515_v33, %v545_v27 }
 0x114   : > { %v507_v28 = vpop.f32.mrf.mxu0 }
 0x115   : > { %v508_v30 = vadd.f32 %v1515_v33, %v507_v28  ;;  %v589_v38 = vmax.f32 %v546_v32, 0.0 }
 0x117   : > { %v574_v31 = vmax.f32 %v508_v30, 0.0 }
 0x119   : > { %v601_v34 = vpack.c.bf16 %v574_v31, %v573_v29 }
 0x11a   : > { %v547_v35 = vpop.f32.mrf.mxu2 }
 0x11b   : > { %v548_v36 = vadd.f32 %v1515_v33, %v547_v35  ;;  %709 = vmatmul.bf16.gmra.mxu1 %v601_v34 }
 0x11c   : > { %v510_v37 = vpop.f32.mrf.mxu0 }
 0x11d   : > { %v590_v39 = vmax.f32 %v548_v36, 0.0  ;;  %v511_v41 = vadd.f32 %v1515_v33, %v510_v37 }
 0x11f   : > { %v609_v40 = vpack.c.bf16 %v590_v39, %v589_v38  ;;  %v575_v44 = vmax.f32 %v511_v41, 0.0 }
 0x121   : > { %749 = vmatmul.bf16.gmra.mxu3 %v609_v40 }
 0x122   : > { %v550_v42 = vpop.f32.mrf.mxu2 }
 0x123   : > { %v551_v47 = vadd.f32 %v1515_v33, %v550_v42 }
 0x124   : > { %v512_v43 = vpop.f32.mrf.mxu0 }
 0x125   : > { %v513_v45 = vadd.f32 %v1515_v33, %v512_v43  ;;  %v591_v52 = vmax.f32 %v551_v47, 0.0 }
 0x127   : > { %v576_v46 = vmax.f32 %v513_v45, 0.0 }
 0x129   : > { %v602_v48 = vpack.c.bf16 %v576_v46, %v575_v44 }
 0x12a   : > { %v552_v49 = vpop.f32.mrf.mxu2 }
 0x12b   : > { %v553_v50 = vadd.f32 %v1515_v33, %v552_v49  ;;  %714 = vmatmul.bf16.gmra.mxu1 %v602_v48 }
 0x12c   : > { %v515_v51 = vpop.f32.mrf.mxu0 }
 0x12d   : > { %v592_v53 = vmax.f32 %v553_v50, 0.0  ;;  %v516_v55 = vadd.f32 %v1515_v33, %v515_v51 }
 0x12f   : > { %v610_v54 = vpack.c.bf16 %v592_v53, %v591_v52  ;;  %v577_v58 = vmax.f32 %v516_v55, 0.0 }
 0x131   : > { %754 = vmatmul.bf16.gmra.mxu3 %v610_v54 }
 0x132   : > { %v555_v56 = vpop.f32.mrf.mxu2 }
 0x133   : > { %v556_v61 = vadd.f32 %v1515_v33, %v555_v56 }
 0x134   : > { %v517_v57 = vpop.f32.mrf.mxu0 }
 0x135   : > { %v518_v59 = vadd.f32 %v1515_v33, %v517_v57  ;;  %v593_v2 = vmax.f32 %v556_v61, 0.0 }
 0x137   : > { %v578_v60 = vmax.f32 %v518_v59, 0.0 }
 0x139   : > { %v603_v62 = vpack.c.bf16 %v578_v60, %v577_v58 }
 0x13a   : > { %v557_v63 = vpop.f32.mrf.mxu2 }
 0x13b   : > { %v558_v0 = vadd.f32 %v1515_v33, %v557_v63  ;;  %719 = vmatmul.bf16.gmra.mxu1 %v603_v62 }
 0x13c   : > { %v520_v1 = vpop.f32.mrf.mxu0 }
 0x13d   : > { %v594_v3 = vmax.f32 %v558_v0, 0.0  ;;  %v521_v5 = vadd.f32 %v1515_v33, %v520_v1 }
 0x13f   : > { %v611_v4 = vpack.c.bf16 %v594_v3, %v593_v2  ;;  %v579_v8 = vmax.f32 %v521_v5, 0.0 }
 0x141   : > { %759 = vmatmul.bf16.gmra.mxu3 %v611_v4 }
 0x142   : > { %v560_v6 = vpop.f32.mrf.mxu2 }
 0x143   : > { %v561_v11 = vadd.f32 %v1515_v33, %v560_v6 }
 0x144   : > { %v522_v7 = vpop.f32.mrf.mxu0 }
 0x145   : > { %v523_v9 = vadd.f32 %v1515_v33, %v522_v7  ;;  %v595_v15 = vmax.f32 %v561_v11, 0.0 }
 0x147   : > { %v580_v10 = vmax.f32 %v523_v9, 0.0 }
 0x149   : > { %v604_v12 = vpack.c.bf16 %v580_v10, %v579_v8 }
 0x14a   : > { %v562_v13 = vpop.f32.mrf.mxu2 }
 0x14b   : > { %v563_v14 = vadd.f32 %v1515_v33, %v562_v13  ;;  %724 = vmatmul.bf16.gmra.mxu1 %v604_v12 }
 0x14d   : > { %v596_v16 = vmax.f32 %v563_v14, 0.0 }
 0x14f   : > { %v612_v17 = vpack.c.bf16 %v596_v16, %v595_v15 }
 0x151   : > { %764 = vmatmul.bf16.gmra.mxu3 %v612_v17 }
 0x158   : > { %v690_v19 = vpop.f32.mrf.mxu1 }
 0x159   : > { %v691_v20 = vadd.f32 %v1553_v18, %v690_v19 }
 0x15b   : > { %770 = vst [vmem:[%s1556_s13] sm:$0xff] %v691_v20 }
 0x160   : > { %v692_v33 = vpop.f32.mrf.mxu1 }
 0x161   : > { %v693_v21 = vadd.f32 %v1553_v18, %v692_v33 }
 0x163   : > { %771 = vst [vmem:[%s1556_s13 + $0x8] sm:$0xff] %v693_v21 }
 0x164   : > { %v730_v22 = vpop.f32.mrf.mxu3 }
 0x165   : > { %v731_v23 = vadd.f32 %v1553_v18, %v730_v22 }
 0x167   : > { %786 = vst [vmem:[%s1556_s13 + $0x80] sm:$0xff] %v731_v23 }
 0x168   : > { %v695_v24 = vpop.f32.mrf.mxu1 }
 0x169   : > { %v696_v25 = vadd.f32 %v1553_v18, %v695_v24 }
 0x16b   : > { %772 = vst [vmem:[%s1556_s13 + $0x10] sm:$0xff] %v696_v25 }
 0x16c   : > { %v732_v26 = vpop.f32.mrf.mxu3 }
 0x16d   : > { %v733_v27 = vadd.f32 %v1553_v18, %v732_v26 }
 0x16f   : > { %787 = vst [vmem:[%s1556_s13 + $0x88] sm:$0xff] %v733_v27 }
 0x170   : > { %v697_v28 = vpop.f32.mrf.mxu1 }
 0x171   : > { %v698_v29 = vadd.f32 %v1553_v18, %v697_v28 }
 0x173   : > { %773 = vst [vmem:[%s1556_s13 + $0x18] sm:$0xff] %v698_v29 }
 0x174   : > { %v735_v30 = vpop.f32.mrf.mxu3 }
 0x175   : > { %v736_v31 = vadd.f32 %v1553_v18, %v735_v30 }
 0x177   : > { %788 = vst [vmem:[%s1556_s13 + $0x90] sm:$0xff] %v736_v31 }
 0x178   : > { %v700_v32 = vpop.f32.mrf.mxu1 }
 0x179   : > { %v701_v34 = vadd.f32 %v1553_v18, %v700_v32 }
 0x17b   : > { %774 = vst [vmem:[%s1556_s13 + $0x20] sm:$0xff] %v701_v34 }
 0x17c   : > { %v737_v35 = vpop.f32.mrf.mxu3 }
 0x17d   : > { %v738_v36 = vadd.f32 %v1553_v18, %v737_v35 }
 0x17f   : > { %789 = vst [vmem:[%s1556_s13 + $0x98] sm:$0xff] %v738_v36 }
 0x180   : > { %v702_v37 = vpop.f32.mrf.mxu1 }
 0x181   : > { %v703_v38 = vadd.f32 %v1553_v18, %v702_v37 }
 0x183   : > { %775 = vst [vmem:[%s1556_s13 + $0x28] sm:$0xff] %v703_v38 }
 0x184   : > { %v740_v39 = vpop.f32.mrf.mxu3 }
 0x185   : > { %v741_v40 = vadd.f32 %v1553_v18, %v740_v39 }
 0x187   : > { %790 = vst [vmem:[%s1556_s13 + $0xa0] sm:$0xff] %v741_v40 }
 0x188   : > { %v705_v41 = vpop.f32.mrf.mxu1 }
 0x189   : > { %v706_v42 = vadd.f32 %v1553_v18, %v705_v41 }
 0x18b   : > { %776 = vst [vmem:[%s1556_s13 + $0x30] sm:$0xff] %v706_v42 }
 0x18c   : > { %v742_v43 = vpop.f32.mrf.mxu3 }
 0x18d   : > { %v743_v44 = vadd.f32 %v1553_v18, %v742_v43 }
 0x18f   : > { %791 = vst [vmem:[%s1556_s13 + $0xa8] sm:$0xff] %v743_v44 }
 0x190   : > { %v707_v45 = vpop.f32.mrf.mxu1 }
 0x191   : > { %v708_v46 = vadd.f32 %v1553_v18, %v707_v45 }
 0x193   : > { %777 = vst [vmem:[%s1556_s13 + $0x38] sm:$0xff] %v708_v46 }
 0x194   : > { %v745_v47 = vpop.f32.mrf.mxu3 }
 0x195   : > { %v746_v48 = vadd.f32 %v1553_v18, %v745_v47 }
 0x197   : > { %792 = vst [vmem:[%s1556_s13 + $0xb0] sm:$0xff] %v746_v48 }
 0x198   : > { %v710_v49 = vpop.f32.mrf.mxu1 }
 0x199   : > { %v711_v50 = vadd.f32 %v1553_v18, %v710_v49 }
 0x19b   : > { %778 = vst [vmem:[%s1556_s13 + $0x40] sm:$0xff] %v711_v50 }
 0x19c   : > { %v747_v51 = vpop.f32.mrf.mxu3 }
 0x19d   : > { %v748_v52 = vadd.f32 %v1553_v18, %v747_v51 }
 0x19f   : > { %793 = vst [vmem:[%s1556_s13 + $0xb8] sm:$0xff] %v748_v52 }
 0x1a0   : > { %v712_v53 = vpop.f32.mrf.mxu1 }
 0x1a1   : > { %v713_v54 = vadd.f32 %v1553_v18, %v712_v53 }
 0x1a3   : > { %779 = vst [vmem:[%s1556_s13 + $0x48] sm:$0xff] %v713_v54 }
 0x1a4   : > { %v750_v55 = vpop.f32.mrf.mxu3 }
 0x1a5   : > { %v751_v56 = vadd.f32 %v1553_v18, %v750_v55 }
 0x1a7   : > { %794 = vst [vmem:[%s1556_s13 + $0xc0] sm:$0xff] %v751_v56 }
 0x1a8   : > { %v715_v57 = vpop.f32.mrf.mxu1 }
 0x1a9   : > { %v716_v58 = vadd.f32 %v1553_v18, %v715_v57 }
 0x1ab   : > { %780 = vst [vmem:[%s1556_s13 + $0x50] sm:$0xff] %v716_v58 }
 0x1ac   : > { %v752_v59 = vpop.f32.mrf.mxu3 }
 0x1ad   : > { %v753_v60 = vadd.f32 %v1553_v18, %v752_v59 }
 0x1af   : > { %795 = vst [vmem:[%s1556_s13 + $0xc8] sm:$0xff] %v753_v60 }
 0x1b0   : > { %v717_v61 = vpop.f32.mrf.mxu1 }
 0x1b1   : > { %v718_v62 = vadd.f32 %v1553_v18, %v717_v61 }
 0x1b3   : > { %781 = vst [vmem:[%s1556_s13 + $0x58] sm:$0xff] %v718_v62 }
 0x1b4   : > { %v755_v63 = vpop.f32.mrf.mxu3 }
 0x1b5   : > { %v756_v0 = vadd.f32 %v1553_v18, %v755_v63 }
 0x1b7   : > { %796 = vst [vmem:[%s1556_s13 + $0xd0] sm:$0xff] %v756_v0 }
 0x1b8   : > { %v720_v1 = vpop.f32.mrf.mxu1 }
 0x1b9   : > { %v721_v2 = vadd.f32 %v1553_v18, %v720_v1 }
 0x1bb   : > { %782 = vst [vmem:[%s1556_s13 + $0x60] sm:$0xff] %v721_v2 }
 0x1bc   : > { %v757_v3 = vpop.f32.mrf.mxu3 }
 0x1bd   : > { %v758_v4 = vadd.f32 %v1553_v18, %v757_v3 }
 0x1bf   : > { %797 = vst [vmem:[%s1556_s13 + $0xd8] sm:$0xff] %v758_v4 }
 0x1c0   : > { %v722_v5 = vpop.f32.mrf.mxu1 }
 0x1c1   : > { %v723_v6 = vadd.f32 %v1553_v18, %v722_v5 }
 0x1c3   : > { %783 = vst [vmem:[%s1556_s13 + $0x68] sm:$0xff] %v723_v6 }
 0x1c4   : > { %v760_v7 = vpop.f32.mrf.mxu3 }
 0x1c5   : > { %v761_v8 = vadd.f32 %v1553_v18, %v760_v7 }
 0x1c7   : > { %798 = vst [vmem:[%s1556_s13 + $0xe0] sm:$0xff] %v761_v8 }
 0x1c8   : > { %v725_v9 = vpop.f32.mrf.mxu1 }
 0x1c9   : > { %v726_v10 = vadd.f32 %v1553_v18, %v725_v9 }
 0x1cb   : > { %784 = vst [vmem:[%s1556_s13 + $0x70] sm:$0xff] %v726_v10 }
 0x1cc   : > { %v762_v11 = vpop.f32.mrf.mxu3 }
 0x1cd   : > { %v763_v12 = vadd.f32 %v1553_v18, %v762_v11 }
 0x1cf   : > { %799 = vst [vmem:[%s1556_s13 + $0xe8] sm:$0xff] %v763_v12 }
 0x1d0   : > { %v727_v13 = vpop.f32.mrf.mxu1 }
 0x1d1   : > { %v728_v14 = vadd.f32 %v1553_v18, %v727_v13 }
 0x1d3   : > { %785 = vst [vmem:[%s1556_s13 + $0x78] sm:$0xff] %v728_v14 }
 0x1d4   : > { %v765_v15 = vpop.f32.mrf.mxu3 }
 0x1d5   : > { %v766_v16 = vadd.f32 %v1553_v18, %v765_v15 }
 0x1d7   : > { %800 = vst [vmem:[%s1556_s13 + $0xf0] sm:$0xff] %v766_v16 }
 0x1dc   : > { %v767_v17 = vpop.f32.mrf.mxu3 }
 0x1dd   : > { %v768_v19 = vadd.f32 %v1553_v18, %v767_v17 }
 0x1df   : > { %801 = vst [vmem:[%s1556_s13 + $0xf8] sm:$0xff] %v768_v19 }
 0x1e0   : > { %1296 = shalt.err (!%p1293_p10)
}
 0x1e1   : > { %s1345_s8 = smov 128   ;;  %s1346_s12 = smov 8  }
 0x1e2   : > { %1116 = dma.vmem_to_hbm [thread:$0]  (%p1449_p3), %s816_s7, 4096, %s818_s26, %s803_s16, %s1345_s8, %s1345_s8, %s1346_s12  }
 0x1e3 PF: > { %s832_s13 = sand.u32 1, %s1327_s18   ;;  %p1668_p12 = scmp.ge.s32.totalorder %s1339_s21, 2 }
 0x1e4   : > { %s833_s15 = scalar_lea.sflag [#allocation4], %s832_s13 }
 0x1e5   : > { %p1130_p13 = pnand %p1668_p12, %p1412_p6 }
 0x1e7   : > { %p1131_p0 = pneg %p1130_p13 }
 0x1e9   : > { %1322 = dma.done.wait (%p1131_p0), %s833_s15, 4096  }
 0x1ea   : > { %1324 = vsyncadd (%p1131_p0), %s833_s15, 4294963200  ;;  %p19_p5 = scmp.ge.s32.totalorder %s1439_s14, 4   ;;  %s1669_s18 = smov %s1331_s19 }
 0x1eb   : > { %s1670_s19 = smov %s1335_s20  ;;  %s1671_s20 = smov %s1455_s23 }
 0x1ec   : > { %s1672_s21 = smov %s1439_s14  ;;  %21 = sbr.rel (!%p19_p5) target bundleno = 6 (0x6), region = 93 }
 0x1f1   :  { %839 = vsyncpa [#allocation3], 1 }
 0x1f2   :  { %841 = vsyncpa [#allocation3 + $0x1], 1 }
 0x1f3   :  { %842 = vsyncpa [#allocation6], 1 }
 0x1f4   :  { %843 = vsyncpa [#allocation4], 1 }
 0x1f5   :  { %845 = vsyncpa [#allocation4 + $0x1], 1 }

</bundles_post_ra>
